<compile_context>
chip_gen: v7x
topology: tpu7x:2x2x1
jax: 0.10.0
libtpu: 0.0.40
codegen_flags: <defaults>
</compile_context>

<pallas_src>
import math

import jax
import jax.numpy as jnp
from jax.experimental import pallas as pl
from jax.experimental.pallas import tpu as pltpu


def _ffn_kernel(x_ref, w1_ref, b1_ref, w2_ref, b2_ref, o_ref, acc_ref):
    # x_ref:  [TM, E]    w1_ref: [E, TH]   b1_ref: [1, TH]
    # w2_ref: [TH, E]    b2_ref: [1, E]    o_ref:  [TM, E]
    # acc_ref: [TM, E] f32 accumulator (resident across the hidden axis)
    j = pl.program_id(1)

    @pl.when(j == 0)
    def _():
        acc_ref[...] = jnp.zeros_like(acc_ref)

    # First linear (hidden chunk): MXU with native-dtype operands, f32 accum.
    h = jnp.dot(x_ref[...], w1_ref[...], preferred_element_type=jnp.float32)
    h = h + b1_ref[...].astype(jnp.float32)

    # GELU (tanh approximation) in f32 on the VPU/EUP.
    c = jnp.float32(math.sqrt(2.0 / math.pi))
    h = 0.5 * h * (1.0 + jnp.tanh(c * (h + 0.044715 * (h * h * h))))

    # Second linear partial sum: cast back to weight dtype for the MXU
    # (no-op for f32 weights), accumulate in f32.
    acc_ref[...] += jnp.dot(h.astype(w2_ref.dtype), w2_ref[...],
                            preferred_element_type=jnp.float32)

    @pl.when(j == pl.num_programs(1) - 1)
    def _():
        o_ref[...] = (acc_ref[...] + b2_ref[...].astype(jnp.float32)
                      ).astype(o_ref.dtype)


def _round_up(a, b):
    return (a + b - 1) // b * b


def _pick_hidden_tile(hidden):
    # Largest multiple-of-128 tile that evenly divides the hidden dim
    # (256-aligned preferred for the v6e/v7x 2x256^2 MXU); fall back to the
    # full hidden dim (valid because a block equal to the full dim always
    # satisfies the (8,128) constraint).
    for th in (1024, 768, 512, 384, 256, 128):
        if hidden % th == 0:
            return th
    return hidden


def feed_forward(x, w1, b1, w2, b2, *, row_tile=256):
    """x: [batch, seq, emb] -> [batch, seq, emb]."""
    batch, seq, emb = x.shape
    hidden = w1.shape[1]
    M = batch * seq

    x2d = x.reshape(M, emb)
    b1_2d = b1.reshape(1, hidden)
    b2_2d = b2.reshape(1, emb)

    # Row tile: multiple of 8 sublanes, capped (<=~512 keeps v7x's 64 MiB VMEM
    # happy); pad M up so the grid divides evenly, slice the pad off after.
    TM = min(row_tile, _round_up(M, 8))
    M_pad = _round_up(M, TM)
    if M_pad != M:
        x2d = jnp.pad(x2d, ((0, M_pad - M), (0, 0)))

    TH = _pick_hidden_tile(hidden)
    nm = M_pad // TM
    nh = hidden // TH

    # NOTE: emb must equal the full last dim (as here) or be a multiple of 128
    # for lane-dense stores; real GPT-2 emb (768) satisfies this.
    itemsize = jnp.dtype(x.dtype).itemsize
    cost = pl.CostEstimate(
        flops=int(4.0 * M_pad * emb * hidden),            # two matmuls
        transcendentals=int(M_pad * hidden),              # tanh per hidden elem
        bytes_accessed=int(
            (x2d.size + w1.size + b1.size + w2.size + b2.size
             + M_pad * emb) * itemsize),
    )

    out2d = pl.pallas_call(
        _ffn_kernel,
        out_shape=jax.ShapeDtypeStruct((M_pad, emb), x.dtype),
        grid_spec=pltpu.PrefetchScalarGridSpec(
            num_scalar_prefetch=0,
            grid=(nm, nh),
            in_specs=[
                pl.BlockSpec((TM, emb), lambda i, j: (i, 0)),    # x (resident over j)
                pl.BlockSpec((emb, TH), lambda i, j: (0, j)),    # W1 chunk
                pl.BlockSpec((1, TH), lambda i, j: (0, j)),      # b1 chunk
                pl.BlockSpec((TH, emb), lambda i, j: (j, 0)),    # W2 chunk
                pl.BlockSpec((1, emb), lambda i, j: (0, 0)),     # b2 (resident)
            ],
            out_specs=pl.BlockSpec((TM, emb), lambda i, j: (i, 0)),
            scratch_shapes=[pltpu.VMEM((TM, emb), jnp.float32)],
        ),
        compiler_params=pltpu.CompilerParams(
            dimension_semantics=("parallel", "arbitrary"),
            vmem_limit_bytes=64 * 1024 * 1024,
        ),
        cost_estimate=cost,
    )(x2d, w1, b1_2d, w2, b2_2d)

    if M_pad != M:
        out2d = out2d[:M]
    return out2d.reshape(batch, seq, emb)


def _reference(x, w1, b1, w2, b2):
    h = jnp.dot(x, w1) + b1
    c = jnp.float32(math.sqrt(2.0 / math.pi))
    h = 0.5 * h * (1.0 + jnp.tanh(c * (h + 0.044715 * h ** 3)))
    return jnp.dot(h, w2) + b2


if __name__ == "__main__":
    # cfg = {'emb_dim': 32}; batch=2, seq=8
    batch, seq, emb = 2, 8, 32
    hidden = 4 * emb

    key = jax.random.PRNGKey(0)
    kx, kw1, kb1, kw2, kb2 = jax.random.split(key, 5)

    x = jax.random.normal(kx, (batch, seq, emb), dtype=jnp.float32)
    # Synthetic parameters matching nn.Linear shapes, stored transposed so the
    # kernel computes x @ W + b.
    w1 = jax.random.normal(kw1, (emb, hidden), dtype=jnp.float32) * 0.02
    b1 = jax.random.normal(kb1, (hidden,), dtype=jnp.float32) * 0.02
    w2 = jax.random.normal(kw2, (hidden, emb), dtype=jnp.float32) * 0.02
    b2 = jax.random.normal(kb2, (emb,), dtype=jnp.float32) * 0.02

    out = feed_forward(x, w1, b1, w2, b2)
    out = jax.block_until_ready(out)

    ref = _reference(x, w1, b1, w2, b2)
    assert out.shape == (batch, seq, emb)
    assert jnp.allclose(out, ref, atol=1e-4, rtol=1e-4), "mismatch vs reference"

    print("KERNEL_OK")
</pallas_src>

<mosaic_0001>
module attributes {stable_mosaic.version = 11 : i64} {
  func.func @_ffn_kernel(%arg0: i32, %arg1: i32, %arg2: memref<16x32xf32, #tpu.memory_space<vmem>>, %arg3: memref<32x128xf32, #tpu.memory_space<vmem>>, %arg4: memref<1x128xf32, #tpu.memory_space<vmem>>, %arg5: memref<128x32xf32, #tpu.memory_space<vmem>>, %arg6: memref<1x32xf32, #tpu.memory_space<vmem>>, %arg7: memref<16x32xf32, #tpu.memory_space<vmem>>, %arg8: memref<16x32xf32, #tpu.memory_space<vmem>>) attributes {dimension_semantics = [#tpu.dimension_semantics<parallel>, #tpu.dimension_semantics<arbitrary>], iteration_bounds = array<i64: 1, 1>, scalar_prefetch = 0 : i64, scratch_operands = 1 : i64, tpu.core_type = #tpu.core_type<tc>, window_params = [{transform_indices = @transform_0, window_bounds = array<i64: 16, 32>}, {transform_indices = @transform_1, window_bounds = array<i64: 32, 128>}, {transform_indices = @transform_2, window_bounds = array<i64: 1, 128>}, {transform_indices = @transform_3, window_bounds = array<i64: 128, 32>}, {pipeline_mode = #tpu.pipeline_mode<synchronous>, transform_indices = @transform_4, window_bounds = array<i64: 1, 32>}, {transform_indices = @transform_5, window_bounds = array<i64: 16, 32>}]} {
    %c0_i32 = arith.constant 0 : i32
    %0 = arith.cmpi eq, %arg1, %c0_i32 : i32
    %1 = arith.extui %0 : i1 to i32
    %c0_i32_0 = arith.constant 0 : i32
    %2 = arith.cmpi ne, %1, %c0_i32_0 : i32
    scf.if %2 {
      %cst_19 = arith.constant 0.000000e+00 : f32
      %30 = vector.broadcast %cst_19 : f32 to vector<16x32xf32>
      %c0_20 = arith.constant 0 : index
      %c0_21 = arith.constant 0 : index
      %31 = vector.load %arg8[%c0_20, %c0_21] : memref<16x32xf32, #tpu.memory_space<vmem>>, vector<16x32xf32>
      tpu.vector_store %arg8[%c0_20, %c0_21], %30 {strides = array<i32>} : memref<16x32xf32, #tpu.memory_space<vmem>>, vector<16x32xf32>,
    } else {
    }
    %c0 = arith.constant 0 : index
    %c0_1 = arith.constant 0 : index
    %3 = vector.load %arg2[%c0, %c0_1] : memref<16x32xf32, #tpu.memory_space<vmem>>, vector<16x32xf32>
    %c0_2 = arith.constant 0 : index
    %c0_3 = arith.constant 0 : index
    %4 = vector.load %arg3[%c0_2, %c0_3] : memref<32x128xf32, #tpu.memory_space<vmem>>, vector<32x128xf32>
    %cst = arith.constant dense<0.000000e+00> : vector<16x128xf32>
    %5 = tpu.matmul %3, %4, %cst {dimension_numbers = #tpu.dot_dimension_numbers<[1], [0], [0], [1], [0, 0, 1, 1], [], []>} : vector<16x32xf32>, vector<32x128xf32>, vector<16x128xf32> -> vector<16x128xf32>
    %c0_4 = arith.constant 0 : index
    %c0_5 = arith.constant 0 : index
    %6 = vector.load %arg4[%c0_4, %c0_5] : memref<1x128xf32, #tpu.memory_space<vmem>>, vector<1x128xf32>
    %7 = vector.broadcast %6 : vector<1x128xf32> to vector<16x128xf32>
    %8 = arith.addf %5, %7 : vector<16x128xf32>
    %cst_6 = arith.constant 5.000000e-01 : f32
    %9 = vector.broadcast %cst_6 : f32 to vector<16x128xf32>
    %10 = arith.mulf %9, %8 : vector<16x128xf32>
    %11 = arith.mulf %8, %8 : vector<16x128xf32>
    %12 = arith.mulf %11, %8 : vector<16x128xf32>
    %cst_7 = arith.constant 4.471500e-02 : f32
    %13 = vector.broadcast %cst_7 : f32 to vector<16x128xf32>
    %14 = arith.mulf %13, %12 : vector<16x128xf32>
    %15 = arith.addf %8, %14 : vector<16x128xf32>
    %cst_8 = arith.constant 0.797884583 : f32
    %16 = vector.broadcast %cst_8 : f32 to vector<16x128xf32>
    %17 = arith.mulf %16, %15 : vector<16x128xf32>
    %18 = math.tanh %17 : vector<16x128xf32>
    %cst_9 = arith.constant 1.000000e+00 : f32
    %19 = vector.broadcast %cst_9 : f32 to vector<16x128xf32>
    %20 = arith.addf %19, %18 : vector<16x128xf32>
    %21 = arith.mulf %10, %20 : vector<16x128xf32>
    %c0_10 = arith.constant 0 : index
    %c0_11 = arith.constant 0 : index
    %22 = vector.load %arg8[%c0_10, %c0_11] : memref<16x32xf32, #tpu.memory_space<vmem>>, vector<16x32xf32>
    %c0_12 = arith.constant 0 : index
    %c0_13 = arith.constant 0 : index
    %23 = vector.load %arg5[%c0_12, %c0_13] : memref<128x32xf32, #tpu.memory_space<vmem>>, vector<128x32xf32>
    %cst_14 = arith.constant dense<0.000000e+00> : vector<16x32xf32>
    %24 = tpu.matmul %21, %23, %cst_14 {dimension_numbers = #tpu.dot_dimension_numbers<[1], [0], [0], [1], [0, 0, 1, 1], [], []>} : vector<16x128xf32>, vector<128x32xf32>, vector<16x32xf32> -> vector<16x32xf32>
    %25 = arith.addf %22, %24 : vector<16x32xf32>
    %c0_15 = arith.constant 0 : index
    %c0_16 = arith.constant 0 : index
    %26 = vector.load %arg8[%c0_15, %c0_16] : memref<16x32xf32, #tpu.memory_space<vmem>>, vector<16x32xf32>
    tpu.vector_store %arg8[%c0_15, %c0_16], %25 {strides = array<i32>} : memref<16x32xf32, #tpu.memory_space<vmem>>, vector<16x32xf32>,
    %c0_i32_17 = arith.constant 0 : i32
    %27 = arith.cmpi eq, %arg1, %c0_i32_17 : i32
    %28 = arith.extui %27 : i1 to i32
    %c0_i32_18 = arith.constant 0 : i32
    %29 = arith.cmpi ne, %28, %c0_i32_18 : i32
    scf.if %29 {
      %c0_19 = arith.constant 0 : index
      %c0_20 = arith.constant 0 : index
      %30 = vector.load %arg8[%c0_19, %c0_20] : memref<16x32xf32, #tpu.memory_space<vmem>>, vector<16x32xf32>
      %c0_21 = arith.constant 0 : index
      %c0_22 = arith.constant 0 : index
      %31 = vector.load %arg6[%c0_21, %c0_22] : memref<1x32xf32, #tpu.memory_space<vmem>>, vector<1x32xf32>
      %32 = vector.broadcast %31 : vector<1x32xf32> to vector<16x32xf32>
      %33 = arith.addf %30, %32 : vector<16x32xf32>
      %c0_23 = arith.constant 0 : index
      %c0_24 = arith.constant 0 : index
      %34 = vector.load %arg7[%c0_23, %c0_24] : memref<16x32xf32, #tpu.memory_space<vmem>>, vector<16x32xf32>
      tpu.vector_store %arg7[%c0_23, %c0_24], %33 {strides = array<i32>} : memref<16x32xf32, #tpu.memory_space<vmem>>, vector<16x32xf32>,
    } else {
    }
    return
  }
  func.func @transform_0(%arg0: i32, %arg1: i32) -> (i32, i32) {
    %c0_i32 = arith.constant 0 : i32
    %c0_i32_0 = arith.constant 0 : i32
    return %arg0, %c0_i32 : i32, i32
  }
  func.func @transform_1(%arg0: i32, %arg1: i32) -> (i32, i32) {
    %c0_i32 = arith.constant 0 : i32
    %c0_i32_0 = arith.constant 0 : i32
    return %c0_i32, %arg1 : i32, i32
  }
  func.func @transform_2(%arg0: i32, %arg1: i32) -> (i32, i32) {
    %c0_i32 = arith.constant 0 : i32
    %c0_i32_0 = arith.constant 0 : i32
    return %c0_i32, %arg1 : i32, i32
  }
  func.func @transform_3(%arg0: i32, %arg1: i32) -> (i32, i32) {
    %c0_i32 = arith.constant 0 : i32
    %c0_i32_0 = arith.constant 0 : i32
    return %arg1, %c0_i32 : i32, i32
  }
  func.func @transform_4(%arg0: i32, %arg1: i32) -> (i32, i32) {
    %c0_i32 = arith.constant 0 : i32
    %c0_i32_0 = arith.constant 0 : i32
    %c0_i32_1 = arith.constant 0 : i32
    return %c0_i32, %c0_i32_0 : i32, i32
  }
  func.func @transform_5(%arg0: i32, %arg1: i32) -> (i32, i32) {
    %c0_i32 = arith.constant 0 : i32
    %c0_i32_0 = arith.constant 0 : i32
    return %arg0, %c0_i32 : i32, i32
  }
}

</mosaic_0001>

<bundles_post_ra>
// kernel: tpu_custom_call.1
= control target key start
LH: loop header
LB: loop body
LE: loop exit
PB: predicated region body
PF: predicated region fallthrough
CT: control target
= control target key end

     0   :  { %10 = vsyncpa [#allocation4], 0  ;;  %s742_s0 = inlined_call_operand.hbm [shape: f32[16,32], index: 0, kind: input, shape index: {}]   ;;  %s743_s1 = inlined_call_operand.hbm [shape: f32[32,128], index: 1, kind: input, shape index: {}]   ;;  %s744_s2 = inlined_call_operand.hbm [shape: f32[1,128], index: 2, kind: input, shape index: {}]   ;;  %s745_s3 = inlined_call_operand.hbm [shape: f32[128,32], index: 3, kind: input, shape index: {}]   ;;  %s746_s4 = inlined_call_operand.hbm [shape: f32[1,32], index: 4, kind: input, shape index: {}]   ;;  %s747_s5 = inlined_call_operand.hbm [shape: f32[16,32], index: 5, kind: output, shape index: {}]  }
   0x1   :  { %11 = vsyncpa [#allocation7], 0 }
   0x2   :  { %12 = vsyncpa [#allocation10], 0 }
   0x3   :  { %13 = vsyncpa [#allocation5], 0  ;;  %s604_s18 = smov [#allocation6]   ;;  %s605_s20 = smov [#allocation9]  }
   0x4   :  { %s31_s19 = sshll.u32 %s604_s18, 4  ;;  %s53_s21 = sshll.u32 %s605_s20, 4  ;;  %s32_s19 = int_to_ptr.vmem [resolvable:$true] %s31_s19  ;;  %s643_s21 = int_to_ptr.vmem [resolvable:$true] %s53_s21 }
   0x5   :  { %s464_s24 = scalar_lea.hbm %s743_s1, 512 }
   0x6   :  { %p465_p0 = scmp.ne.s32.totalorder %s743_s1, %s464_s24  ;;  %p468_p1 = scmp.lt.u32.totalorder %s464_s24, %s743_s1 }
   0x8   :  { %p470_p2 = pnand %p468_p1, %p465_p0 }
   0xa   :  { %473 = shalt.err (!%p470_p2)
}
   0xb   :  { %s474_s29 = scalar_lea.vmem %s32_s19, 512  ;;  %p479_p4 = scmp.lt.s32.totalorder %s32_s19, %s32_s19 }
   0xc   :  { %p475_p3 = scmp.ne.s32.totalorder %s32_s19, %s474_s29  ;;  %p480_p5 = scmp.lt.s32.totalorder %s474_s29, %s474_s29 }
   0xe   :  { %p481_p6 = por %p480_p5, %p479_p4 }
  0x10   :  { %p482_p7 = pnand %p481_p6, %p475_p3 }
  0x12   :  { %485 = shalt.err (!%p482_p7)
}
  0x13   :  { %s606_s30 = smov 128   ;;  %s607_s6 = smov 8  }
  0x14   :  { %37 = dma.hbm_to_vmem [thread:$0]  %s743_s1, 512, %s32_s19, [#allocation7], %s606_s30, %s606_s30, %s607_s6  }
  0x15   :  { %s486_s11 = scalar_lea.hbm %s745_s3, 2048 }
  0x16   :  { %p487_p8 = scmp.ne.s32.totalorder %s745_s3, %s486_s11  ;;  %p490_p9 = scmp.lt.u32.totalorder %s486_s11, %s745_s3 }
  0x18   :  { %p492_p10 = pnand %p490_p9, %p487_p8 }
  0x1a   :  { %495 = shalt.err (!%p492_p10)
}
  0x1b   :  { %s496_s16 = scalar_lea.vmem %s643_s21, 2048  ;;  %p501_p12 = scmp.lt.s32.totalorder %s643_s21, %s643_s21 }
  0x1c   :  { %p497_p11 = scmp.ne.s32.totalorder %s643_s21, %s496_s16  ;;  %p502_p13 = scmp.lt.s32.totalorder %s496_s16, %s496_s16 }
  0x1e   :  { %p503_p0 = por %p502_p13, %p501_p12 }
  0x20   :  { %p504_p1 = pnand %p503_p0, %p497_p11 }
  0x22   :  { %507 = shalt.err (!%p504_p1)
}
  0x23   :  { %59 = dma.hbm_to_vmem [thread:$0]  %s745_s3, 2048, %s643_s21, [#allocation10], %s606_s30, %s606_s30, %s607_s6  }
  0x24   :  { %s608_s18 = smov [#allocation3]   ;;  %s609_s20 = smov [#allocation8]  }
  0x25   :  { %s19_s19 = sshll.u32 %s608_s18, 4  ;;  %s44_s22 = sshll.u32 %s609_s20, 4  ;;  %s20_s19 = int_to_ptr.vmem [resolvable:$true] %s19_s19  ;;  %s45_s22 = int_to_ptr.vmem [resolvable:$true] %s44_s22 }
  0x26   :  { %s508_s25 = scalar_lea.hbm %s742_s0, 256 }
  0x27   :  { %p509_p2 = scmp.ne.s32.totalorder %s742_s0, %s508_s25  ;;  %p512_p3 = scmp.lt.u32.totalorder %s508_s25, %s742_s0 }
  0x29   :  { %p514_p4 = pnand %p512_p3, %p509_p2 }
  0x2b   :  { %517 = shalt.err (!%p514_p4)
}
  0x2c   :  { %s518_s3 = scalar_lea.vmem %s20_s19, 256  ;;  %p523_p6 = scmp.lt.s32.totalorder %s20_s19, %s20_s19 }
  0x2d   :  { %p519_p5 = scmp.ne.s32.totalorder %s20_s19, %s518_s3  ;;  %p524_p7 = scmp.lt.s32.totalorder %s518_s3, %s518_s3 }
  0x2f   :  { %p525_p8 = por %p524_p7, %p523_p6 }
  0x31   :  { %p526_p9 = pnand %p525_p8, %p519_p5 }
  0x33   :  { %529 = shalt.err (!%p526_p9)
}
  0x34   :  { %25 = dma.hbm_to_vmem [thread:$0]  %s742_s0, 256, %s20_s19, [#allocation4], %s606_s30, %s606_s30, %s607_s6  }
  0x35   :  { %s530_s10 = scalar_lea.hbm %s744_s2, 16 }
  0x36   :  { %p531_p10 = scmp.ne.s32.totalorder %s744_s2, %s530_s10  ;;  %p534_p11 = scmp.lt.u32.totalorder %s530_s10, %s744_s2 }
  0x38   :  { %p536_p12 = pnand %p534_p11, %p531_p10 }
  0x3a   :  { %539 = shalt.err (!%p536_p12)
}
  0x3b   :  { %s540_s15 = scalar_lea.vmem %s45_s22, 16  ;;  %s544_s16 = scalar_lea.vmem %s45_s22, 32 }
  0x3c   :  { %p541_p13 = scmp.ne.s32.totalorder %s45_s22, %s540_s15  ;;  %p545_p0 = scmp.lt.s32.totalorder %s45_s22, %s45_s22 }
  0x3d   :  { %p546_p1 = scmp.lt.s32.totalorder %s544_s16, %s540_s15 }
  0x3f   :  { %p547_p2 = por %p546_p1, %p545_p0 }
  0x41   :  { %p548_p3 = pnand %p547_p2, %p541_p13 }
  0x43   :  { %551 = shalt.err (!%p548_p3)
}
  0x44   :  { %47 = dma.hbm_to_vmem [thread:$0]  %s744_s2, 16, %s45_s22, [#allocation7]  }
  0x45   :  { %s610_s17 = smov [#allocation11]   ;;  %s552_s23 = scalar_lea.hbm %s746_s4, 16 }
  0x46   :  { %s66_s18 = sshll.u32 %s610_s17, 4  ;;  %p553_p4 = scmp.ne.s32.totalorder %s746_s4, %s552_s23  ;;  %s67_s18 = int_to_ptr.vmem [resolvable:$true] %s66_s18 }
  0x47   :  { %p556_p5 = scmp.lt.u32.totalorder %s552_s23, %s746_s4 }
  0x49   :  { %p558_p6 = pnand %p556_p5, %p553_p4 }
  0x4b   :  { %561 = shalt.err (!%p558_p6)
}
  0x4c   :  { %s562_s28 = scalar_lea.vmem %s67_s18, 16  ;;  %s566_s2 = scalar_lea.vmem %s67_s18, 32 }
  0x4d   :  { %p563_p7 = scmp.ne.s32.totalorder %s67_s18, %s562_s28  ;;  %p567_p8 = scmp.lt.s32.totalorder %s67_s18, %s67_s18 }
  0x4e   :  { %p568_p9 = scmp.lt.s32.totalorder %s566_s2, %s562_s28 }
  0x50   :  { %p569_p10 = por %p568_p9, %p567_p8 }
  0x52   :  { %p570_p11 = pnand %p569_p10, %p563_p7 }
  0x54   :  { %573 = shalt.err (!%p570_p11)
}
  0x55   :  { %69 = dma.hbm_to_vmem [thread:$0]  %s746_s4, 16, %s67_s18, [#allocation10]  }
  0x56   :  { %596 = dma.done.wait [#allocation4], 256  }
  0x57   :  { %597 = vsyncadd [#allocation4], 4294967040 }
  0x58   :  { %598 = dma.done.wait [#allocation7], 528  }
  0x59   :  { %599 = vsyncadd [#allocation7], 4294966768 }
  0x5a   :  { %600 = dma.done.wait [#allocation10], 2064  }
  0x5b   :  { %601 = vsyncadd [#allocation10], 4294965232  ;;  %vm89_vm0 = vcmask 261120   ;;  %v94_v0 = vld [vmem:[#allocation6] sm:$0xff]  ;;  %v95_v1 = vld [vmem:[#allocation6 + $0x8] sm:$0xff]  ;;  %v611_v32 = vmov 0.0  }
  0x5c   :  { %v96_v2 = vld [vmem:[#allocation6 + $0x10] sm:$0xff]  ;;  %v411_v3 = vpack.c.bf16 %v95_v1, %v94_v0  ;;  %v97_v4 = vld [vmem:[#allocation6 + $0x18] sm:$0xff]  ;;  %v207_v7 = vld [vmem:[#allocation9] sm:$0xff]  ;;  %91 = vst.msk [vmem:[#allocation2 + $0x8] sm:$0xff] %vm89_vm0, %v611_v32  ;;  %s612_s4 = smov [#allocation12]  }
  0x5d   :  { %v92_v5 = vld [vmem:[#allocation3] sm:$0xff]  ;;  %v415_v6 = vpack.c.bf16 %v97_v4, %v96_v2  ;;  %v93_v10 = vld [vmem:[#allocation3 + $0x8] sm:$0xff]  ;;  %v211_v14 = vld [vmem:[#allocation9 + $0x20] sm:$0xff]  ;;  %90 = vst.msk [vmem:[#allocation2] sm:$0xff] %vm89_vm0, %v611_v32  ;;  %s323_s3 = sshll.u32 %s612_s4, 4  ;;  %s324_s3 = int_to_ptr.vmem [resolvable:$true] %s323_s3 }
  0x5e   :  { %373 = vmatprep.mubr.msk.f32.mxu0 %vm89_vm0, %v92_v5  ;;  %v208_v8 = vld [vmem:[#allocation9 + $0x8] sm:$0xff]  ;;  %412 = vmatprep.subr.bf16.mxu0 %v411_v3  ;;  %v209_v11 = vld [vmem:[#allocation9 + $0x10] sm:$0xff]  ;;  %v210_v12 = vld [vmem:[#allocation9 + $0x18] sm:$0xff]  ;;  %s574_s21 = scalar_lea.vmem %s324_s3, 256  ;;  %p579_p13 = scmp.lt.s32.totalorder %s324_s3, %s324_s3 }
  0x5f   :  { %v419_v9 = vpack.c.bf16 %v208_v8, %v207_v7  ;;  %414 = vmatpush3.bf16.msra.mxu0 %v411_v3  ;;  %v423_v13 = vpack.c.bf16 %v210_v12, %v209_v11  ;;  %v212_v15 = vld [vmem:[#allocation9 + $0x28] sm:$0xff]  ;;  %v213_v17 = vld [vmem:[#allocation9 + $0x30] sm:$0xff]  ;;  %v214_v18 = vld [vmem:[#allocation9 + $0x38] sm:$0xff]  ;;  %p575_p12 = scmp.ne.s32.totalorder %s324_s3, %s574_s21  ;;  %p580_p0 = scmp.lt.s32.totalorder %s574_s21, %s574_s21 }
  0x60   :  { %416 = vmatprep.subr.bf16.mxu0 %v415_v6  ;;  %v427_v16 = vpack.c.bf16 %v212_v15, %v211_v14  ;;  %v431_v19 = vpack.c.bf16 %v214_v18, %v213_v17  ;;  %v215_v20 = vld [vmem:[#allocation9 + $0x40] sm:$0xff]  ;;  %v216_v21 = vld [vmem:[#allocation9 + $0x48] sm:$0xff]  ;;  %v217_v22 = vld [vmem:[#allocation9 + $0x50] sm:$0xff] }
  0x61   :  { %420 = vmatprep.subr.bf16.mxu1 %v419_v9  ;;  %v435_v23 = vpack.c.bf16 %v216_v21, %v215_v20  ;;  %v218_v24 = vld [vmem:[#allocation9 + $0x58] sm:$0xff]  ;;  %v219_v26 = vld [vmem:[#allocation9 + $0x60] sm:$0xff]  ;;  %v220_v27 = vld [vmem:[#allocation9 + $0x68] sm:$0xff]  ;;  %p581_p1 = por %p580_p0, %p579_p13 }
  0x62   :  { %422 = vmatpush3.bf16.msra.mxu1 %v419_v9  ;;  %v439_v25 = vpack.c.bf16 %v218_v24, %v217_v22  ;;  %v443_v28 = vpack.c.bf16 %v220_v27, %v219_v26  ;;  %v221_v29 = vld [vmem:[#allocation9 + $0x70] sm:$0xff]  ;;  %v222_v30 = vld [vmem:[#allocation9 + $0x78] sm:$0xff]  ;;  %v340_v62 = vld [vmem:[#allocation11] ss:$0 sm:$0xff] }
  0x63   :  { %418 = vmatpush3.bf16.msra.mxu0 %v415_v6  ;;  %424 = vmatprep.subr.bf16.mxu1 %v423_v13  ;;  %v447_v31 = vpack.c.bf16 %v222_v30, %v221_v29  ;;  %v337_v33 = vld [vmem:[#allocation8] ss:$0 sm:$0xff]  ;;  %v206_v56 = vld [vmem:[#allocation2 + $0x8] sm:$0xff]  ;;  %p582_p2 = pnand %p581_p1, %p575_p12 }
  0x64   :  { %v205_v57 = vld [vmem:[#allocation2] sm:$0xff] }
  0x66   :  { %374 = vmatmul.mubr.msk.f32.vlgmr.msra.gmra.mrb[0].mxu0 %vm89_vm0, %v93_v10  ;;  %426 = vmatpush3.bf16.msra.mxu1 %v423_v13 }
  0x67   :  { %428 = vmatprep.subr.bf16.mxu1 %v427_v16 }
  0x6a   :  { %430 = vmatpush3.bf16.msra.mxu1 %v427_v16 }
  0x6b   :  { %432 = vmatprep.subr.bf16.mxu1 %v431_v19 }
  0x6e   :  { %434 = vmatpush3.bf16.msra.mxu1 %v431_v19 }
  0x6f   :  { %436 = vmatprep.subr.bf16.mxu1 %v435_v23 }
  0x72   :  { %438 = vmatpush3.bf16.msra.mxu1 %v435_v23 }
  0x73   :  { %440 = vmatprep.subr.bf16.mxu1 %v439_v25 }
  0x76   :  { %442 = vmatpush3.bf16.msra.mxu1 %v439_v25 }
  0x77   :  { %444 = vmatprep.subr.bf16.mxu1 %v443_v28 }
  0x7a   :  { %446 = vmatpush3.bf16.msra.mxu1 %v443_v28 }
  0x7b   :  { %448 = vmatprep.subr.bf16.mxu1 %v447_v31 }
  0x7e   :  { %450 = vmatpush3.bf16.msra.mxu1 %v447_v31 }
 0x139   :  { %v375_v34 = vpop.f32.mrb[0].mxu0 }
 0x13a   :  { %v184_v35 = vadd.f32 %v375_v34, %v337_v33  ;;  %v178_v36 = vpop.f32.mrb[1].mxu0 }
 0x13b   :  { %v179_v37 = vadd.f32 %v337_v33, %v178_v36 }
 0x13c   :  { %v190_v38 = vmul.f32 %v184_v35, %v184_v35  ;;  %v188_v53 = vmul.f32 0.5, %v184_v35 }
 0x13d   :  { %v189_v39 = vmul.f32 %v179_v37, %v179_v37  ;;  %v187_v51 = vmul.f32 0.5, %v179_v37 }
 0x13e   :  { %v192_v40 = vmul.f32 %v190_v38, %v184_v35 }
 0x13f   :  { %v191_v41 = vmul.f32 %v189_v39, %v179_v37 }
 0x140   :  { %v194_v42 = vmul.f32 0.044715, %v192_v40 }
 0x141   :  { %v193_v43 = vmul.f32 0.044715, %v191_v41 }
 0x142   :  { %v196_v44 = vadd.f32 %v194_v42, %v184_v35 }
 0x143   :  { %v195_v45 = vadd.f32 %v193_v43, %v179_v37 }
 0x144   :  { %v198_v46 = vmul.f32 0.7978846, %v196_v44 }
 0x145   :  { %v197_v47 = vmul.f32 0.7978846, %v195_v45 }
 0x146   :  { %460 = vtanh.f32 %v198_v46 }
 0x147   :  { %462 = vtanh.f32 %v197_v47 }
 0x150   :  { %v461_v48 = vpop.eup %460 }
 0x151   :  { %v463_v49 = vpop.eup %462  ;;  %v202_v50 = vadd.f32 1.0, %v461_v48 }
 0x152   :  { %v201_v52 = vadd.f32 1.0, %v463_v49 }
 0x153   :  { %v204_v55 = vmul.f32 %v202_v50, %v188_v53 }
 0x154   :  { %v203_v54 = vmul.f32 %v201_v52, %v187_v51 }
 0x156   :  { %408 = vmatprep.mubr.f32.mxu1 %v203_v54 }
 0x157   :  { %409 = vmatmul.mubr.f32.vlgmr.msra.gmra.mrb[0].mxu1 %v204_v55 }
 0x22a   :  { %v410_v58 = vpop.f32.mrb[0].mxu1 }
 0x22b   :  { %v299_v59 = vadd.f32 %v410_v58, %v206_v56  ;;  %v289_v60 = vpop.f32.mrb[1].mxu1 }
 0x22c   :  { %v298_v61 = vadd.f32 %v289_v60, %v205_v57 }
 0x22d   :  { %301 = vst.msk [vmem:[#allocation2 + $0x8] sm:$0xff] %vm89_vm0, %v299_v59 }
 0x22e   :  { %300 = vst.msk [vmem:[#allocation2] sm:$0xff] %vm89_vm0, %v298_v61 }
 0x234   :  { %v306_v63 = vld [vmem:[#allocation2 + $0x8] sm:$0xff] }
 0x235   :  { %v305_v0 = vld [vmem:[#allocation2] sm:$0xff]  ;;  %v315_v1 = vadd.f32 %v340_v62, %v306_v63 }
 0x236   :  { %v314_v2 = vadd.f32 %v340_v62, %v305_v0 }
 0x237   :  { %317 = vst.msk [vmem:[#allocation12 + $0x8] sm:$0xff] %vm89_vm0, %v315_v1 }
 0x238   :  { %316 = vst.msk [vmem:[#allocation12] sm:$0xff] %vm89_vm0, %v314_v2 }
 0x239   :  { %585 = shalt.err (!%p582_p2)
}
 0x23a   :  { %s586_s9 = scalar_lea.hbm %s747_s5, 256 }
 0x23b   :  { %p587_p3 = scmp.ne.s32.totalorder %s747_s5, %s586_s9  ;;  %p590_p4 = scmp.lt.u32.totalorder %s586_s9, %s747_s5 }
 0x23d   :  { %p592_p5 = pnand %p590_p4, %p587_p3 }
 0x23f   :  { %595 = shalt.err (!%p592_p5)
}
 0x240   :  { %329 = dma.vmem_to_hbm [thread:$0]  %s324_s3, 256, %s747_s5, [#allocation5], %s606_s30, %s606_s30, %s607_s6  }
 0x241   :  { %602 = dma.done.wait [#allocation5], 256  }
 0x242   :  { %603 = vsyncadd [#allocation5], 4294967040 }
 0x243   :  { %333 = vsyncpa [#allocation4], 1 }
 0x244   :  { %334 = vsyncpa [#allocation7], 1 }
 0x245   :  { %335 = vsyncpa [#allocation10], 1 }
 0x246   :  { %336 = vsyncpa [#allocation5], 1 }

</bundles_post_ra>
